<compile_context>
chip_gen: v6e
topology: v6e:2x2x1
jax: 0.10.0
libtpu: 0.0.40
codegen_flags: <defaults>
</compile_context>

<pallas_src>
import functools

import jax
import jax.numpy as jnp
from jax.experimental import pallas as pl
from jax.experimental.pallas import tpu as pltpu

_LANES = 512          # lane-dense last dim (multiple of 128)
_MAX_TILE_ROWS = 256  # (256, 512) f32 block = 512 KiB; x2 inputs + 1 output,
                      # double-buffered -> ~3 MiB VMEM, safe on v5e/v6e/v7x.


def _round_up(x, m):
    return ((x + m - 1) // m) * m


# --------------------------------------------------------------------------- #
# Kernel: out = where(bits < threshold, x / keep_prob, 0)   (pure streaming)
# --------------------------------------------------------------------------- #
def _dropout_kernel(bits_ref, x_ref, o_ref, *, threshold, inv_keep):
    keep = bits_ref[...] < jnp.uint32(threshold)
    x = x_ref[...]
    scaled = x * inv_keep                      # stays in x's dtype (weak-typed scale)
    zero = jnp.zeros((), dtype=x.dtype)
    o_ref[...] = jnp.where(keep, scaled, zero).astype(o_ref.dtype)


def _masked_scale_2d(x2d, bits2d, *, threshold, inv_keep, tile_rows):
    rows, lanes = x2d.shape
    grid = (rows // tile_rows,)
    kern = functools.partial(_dropout_kernel, threshold=threshold, inv_keep=inv_keep)
    return pl.pallas_call(
        kern,
        out_shape=jax.ShapeDtypeStruct((rows, lanes), x2d.dtype),
        grid=grid,
        in_specs=[
            pl.BlockSpec((tile_rows, lanes), lambda i: (i, 0)),   # bits
            pl.BlockSpec((tile_rows, lanes), lambda i: (i, 0)),   # data
        ],
        out_specs=pl.BlockSpec((tile_rows, lanes), lambda i: (i, 0)),
        compiler_params=pltpu.CompilerParams(
            dimension_semantics=("parallel",)),   # 2 TCs on v7x; harmless elsewhere
    )(bits2d, x2d)


# --------------------------------------------------------------------------- #
# Wrapper-side layout plumbing: flatten + pad to a lane-dense (rows, 512) slab
# --------------------------------------------------------------------------- #
def _pack_2d(flat):
    n = flat.shape[0]
    rows = max(-(-n // _LANES), 1)
    rows = _round_up(rows, 8)                        # sublane-aligned
    tile_rows = min(_MAX_TILE_ROWS, rows)
    rows = _round_up(rows, tile_rows)
    flat = jnp.pad(flat, (0, rows * _LANES - n))
    return flat.reshape(rows, _LANES), tile_rows


def _dropout_flat(flat_x, flat_bits, *, threshold, inv_keep):
    n = flat_x.shape[0]
    x2d, tile_rows = _pack_2d(flat_x)
    b2d, _ = _pack_2d(flat_bits)
    out2d = _masked_scale_2d(x2d, b2d, threshold=threshold,
                             inv_keep=inv_keep, tile_rows=tile_rows)
    return out2d.reshape(-1)[:n]


class Dropout:
    """Combined dropout for tuples (s, V) -- Pallas TPU version."""

    def __init__(self, drop_rate):
        self.drop_rate = float(drop_rate)
        self.training = True
        # dummy_param in the PyTorch module only tracked the device; nothing to init.

    def __call__(self, x, seed=0):
        if not self.training or self.drop_rate == 0.0:
            return x

        is_tuple = isinstance(x, (tuple, list))
        if self.drop_rate >= 1.0:                 # everything dropped
            if is_tuple:
                return (jnp.zeros_like(x[0]), jnp.zeros_like(x[1]))
            return jnp.zeros_like(x)

        keep_prob = 1.0 - self.drop_rate
        inv_keep = 1.0 / keep_prob
        threshold = min(int(round(keep_prob * (1 << 32))), (1 << 32) - 1)

        key = jax.random.PRNGKey(seed)
        k_s, k_v = jax.random.split(key)

        if not is_tuple:
            s = x
            s_flat = s.reshape(-1)
            bits_s = jax.random.bits(k_s, s.shape, dtype=jnp.uint32).reshape(-1)
            out = _dropout_flat(s_flat, bits_s, threshold=threshold, inv_keep=inv_keep)
            return out.reshape(s.shape)

        s, v = x
        s_flat = s.reshape(-1)
        bits_s = jax.random.bits(k_s, s.shape, dtype=jnp.uint32).reshape(-1)

        # One Bernoulli per vector channel (shape v.shape[:-1]); broadcast across the
        # trailing vector dim so whole (.., 3) vectors are kept/dropped together.
        bits_v = jax.random.bits(k_v, v.shape[:-1], dtype=jnp.uint32)
        bits_v = jnp.broadcast_to(bits_v[..., None], v.shape).reshape(-1)
        v_flat = v.reshape(-1)

        if s.dtype == v.dtype:
            # Fused: one lane-dense streaming pallas_call for both s and V.
            x_all = jnp.concatenate([s_flat, v_flat])
            b_all = jnp.concatenate([bits_s, bits_v])
            out = _dropout_flat(x_all, b_all, threshold=threshold, inv_keep=inv_keep)
            ns = s_flat.shape[0]
            s_out = out[:ns].reshape(s.shape)
            v_out = out[ns:ns + v_flat.shape[0]].reshape(v.shape)
        else:
            # TODO(synk): mixed s/V dtypes fall back to two pallas_calls to avoid a lossy cast.
            s_out = _dropout_flat(s_flat, bits_s, threshold=threshold,
                                  inv_keep=inv_keep).reshape(s.shape)
            v_out = _dropout_flat(v_flat, bits_v, threshold=threshold,
                                  inv_keep=inv_keep).reshape(v.shape)
        return (s_out, v_out)


if __name__ == "__main__":
    key = jax.random.PRNGKey(0)
    k_s, k_v = jax.random.split(key)

    N, NS, NV = 8, 32, 4
    drop_rate = 0.25
    keep = 1.0 - drop_rate

    s = jax.random.normal(k_s, (N, NS), dtype=jnp.float32)
    v = jax.random.normal(k_v, (N, NV, 3), dtype=jnp.float32)

    drop = Dropout(drop_rate)
    s_out, v_out = drop((s, v), seed=123)
    jax.block_until_ready(s_out)
    jax.block_until_ready(v_out)

    # --- sanity checks -----------------------------------------------------
    # scalar dropout: each element is either 0 or x / keep
    s_np = jax.device_get(s_out)
    s_ref = jax.device_get(s) / keep
    zero_s = abs(s_np) < 1e-6
    keep_s = abs(s_np - s_ref) < 1e-4
    ok_s = bool((zero_s | keep_s).all())
    ok_s_mix = bool(zero_s.any()) and bool(keep_s.any())   # mask not degenerate

    # vector dropout: entire (3,)-vectors dropped together
    v_np = jax.device_get(v_out)
    v_ref = jax.device_get(v) / keep
    chan_zero = (abs(v_np) < 1e-6).all(axis=-1)
    chan_keep = (abs(v_np - v_ref) < 1e-4).all(axis=-1)
    ok_v = bool((chan_zero | chan_keep).all())

    # single-tensor path behaves like scalar dropout
    s_single = drop(s, seed=7)
    jax.block_until_ready(s_single)
    s1 = jax.device_get(s_single)
    ok_single = bool(((abs(s1) < 1e-6) | (abs(s1 - s_ref) < 1e-4)).all())

    # eval mode is identity
    drop.training = False
    s_eval, v_eval = drop((s, v))
    ok_eval = bool((s_eval == s).all()) and bool((v_eval == v).all())

    assert ok_s and ok_s_mix and ok_v and ok_single and ok_eval
    print("KERNEL_OK")
</pallas_src>

<mosaic_0001>
module attributes {stable_mosaic.version = 11 : i64} {
  func.func @_dropout_kernel(%arg0: i32, %arg1: memref<8x512xi32, #tpu.memory_space<vmem>>, %arg2: memref<8x512xf32, #tpu.memory_space<vmem>>, %arg3: memref<8x512xf32, #tpu.memory_space<vmem>>) attributes {dimension_semantics = [#tpu.dimension_semantics<parallel>], iteration_bounds = array<i64: 1>, scalar_prefetch = 0 : i64, scratch_operands = 0 : i64, tpu.core_type = #tpu.core_type<tc>, window_params = [{transform_indices = @transform_0, window_bounds = array<i64: 8, 512>}, {transform_indices = @transform_1, window_bounds = array<i64: 8, 512>}, {transform_indices = @transform_2, window_bounds = array<i64: 8, 512>}]} {
    %c0 = arith.constant 0 : index
    %c0_0 = arith.constant 0 : index
    %0 = vector.load %arg1[%c0, %c0_0] : memref<8x512xi32, #tpu.memory_space<vmem>>, vector<8x512xi32>
    %c-1073741824_i32 = arith.constant -1073741824 : i32
    %1 = vector.broadcast %c-1073741824_i32 : i32 to vector<8x512xi32>
    %2 = arith.cmpi ult, %0, %1 : vector<8x512xi32>
    %c0_1 = arith.constant 0 : index
    %c0_2 = arith.constant 0 : index
    %3 = vector.load %arg2[%c0_1, %c0_2] : memref<8x512xf32, #tpu.memory_space<vmem>>, vector<8x512xf32>
    %cst = arith.constant 1.33333337 : f32
    %4 = vector.broadcast %cst : f32 to vector<8x512xf32>
    %5 = arith.mulf %3, %4 : vector<8x512xf32>
    %cst_3 = arith.constant 0.000000e+00 : f32
    %6 = vector.broadcast %cst_3 : f32 to vector<8x512xf32>
    %7 = arith.select %2, %5, %6 : vector<8x512xi1>, vector<8x512xf32>
    %c0_4 = arith.constant 0 : index
    %c0_5 = arith.constant 0 : index
    %8 = vector.load %arg3[%c0_4, %c0_5] : memref<8x512xf32, #tpu.memory_space<vmem>>, vector<8x512xf32>
    tpu.vector_store %arg3[%c0_4, %c0_5], %7 {strides = array<i32>} : memref<8x512xf32, #tpu.memory_space<vmem>>, vector<8x512xf32>,
    return
  }
  func.func @transform_0(%arg0: i32) -> (i32, i32) {
    %c0_i32 = arith.constant 0 : i32
    %c0_i32_0 = arith.constant 0 : i32
    return %arg0, %c0_i32 : i32, i32
  }
  func.func @transform_1(%arg0: i32) -> (i32, i32) {
    %c0_i32 = arith.constant 0 : i32
    %c0_i32_0 = arith.constant 0 : i32
    return %arg0, %c0_i32 : i32, i32
  }
  func.func @transform_2(%arg0: i32) -> (i32, i32) {
    %c0_i32 = arith.constant 0 : i32
    %c0_i32_0 = arith.constant 0 : i32
    return %arg0, %c0_i32 : i32, i32
  }
}

</mosaic_0001>

<bundles_post_ra>
// kernel: tpu_custom_call.1
= control target key start
LH: loop header
LB: loop body
LE: loop exit
PB: predicated region body
PF: predicated region fallthrough
CT: control target
= control target key end

     0   :  { %7 = vsyncpa [#allocation3], 0  ;;  %s172_s0 = inlined_call_operand.hbm [shape: u32[8,512], index: 0, kind: input, shape index: {}]   ;;  %s173_s1 = inlined_call_operand.hbm [shape: f32[8,512], index: 1, kind: input, shape index: {}]   ;;  %s174_s2 = inlined_call_operand.hbm [shape: f32[8,512], index: 2, kind: output, shape index: {}]  }
   0x1   :  { %8 = vsyncpa [#allocation6], 0 }
   0x2   :  { %9 = vsyncpa [#allocation4], 0  ;;  %s145_s9 = smov [#allocation2]   ;;  %s146_s11 = smov [#allocation5]  }
   0x3   :  { %s16_s10 = sshll.u32 %s145_s9, 4  ;;  %s26_s12 = sshll.u32 %s146_s11, 4  ;;  %s17_s10 = int_to_ptr.vmem [resolvable:$true] %s16_s10  ;;  %s27_s12 = int_to_ptr.vmem [resolvable:$true] %s26_s12 }
   0x4   :  { %s87_s13 = scalar_lea.vmem %s17_s10, 512  ;;  %p92_p1 = scmp.lt.s32.totalorder %s17_s10, %s17_s10 }
   0x5   :  { %p88_p0 = scmp.ne.s32.totalorder %s17_s10, %s87_s13  ;;  %p93_p2 = scmp.lt.s32.totalorder %s87_s13, %s87_s13 }
   0x7   :  { %p94_p3 = por %p93_p2, %p92_p1 }
   0x9   :  { %p95_p4 = pnand %p94_p3, %p88_p0 }
   0xb   :  { %98 = shalt.err (!%p95_p4)
}
   0xc   :  { %19 = dma.hbm_to_vmem [thread:$0]  %s172_s0, 512, %s17_s10, [#allocation3]  }
   0xd   :  { %s107_s16 = scalar_lea.vmem %s27_s12, 512  ;;  %p112_p6 = scmp.lt.s32.totalorder %s27_s12, %s27_s12 }
   0xe   :  { %p108_p5 = scmp.ne.s32.totalorder %s27_s12, %s107_s16  ;;  %p113_p7 = scmp.lt.s32.totalorder %s107_s16, %s107_s16 }
  0x10   :  { %p114_p8 = por %p113_p7, %p112_p6 }
  0x12   :  { %p115_p9 = pnand %p114_p8, %p108_p5 }
  0x14   :  { %118 = shalt.err (!%p115_p9)
}
  0x15   :  { %29 = dma.hbm_to_vmem [thread:$0]  %s173_s1, 512, %s27_s12, [#allocation6]  }
  0x16   :  { %139 = dma.done.wait [#allocation3], 512  }
  0x17   :  { %140 = vsyncadd [#allocation3], 4294966784 }
  0x18   :  { %141 = dma.done.wait [#allocation6], 512  }
  0x19   :  { %142 = vsyncadd [#allocation6], 4294966784  ;;  %v36_v0 = vld [vmem:[#allocation2] sm:$0xff]  ;;  %v37_v2 = vld [vmem:[#allocation2 + $0x8] sm:$0xff]  ;;  %s147_s19 = smov [#allocation7]  }
  0x1a   :  { %v44_v1 = vld [vmem:[#allocation5] sm:$0xff]  ;;  %s66_s0 = sshll.u32 %s147_s19, 4  ;;  %vm40_vm0 = vcmp.lt.u32.totalorder %v36_v0, 3221225472  ;;  %vm41_vm1 = vcmp.lt.u32.totalorder %v37_v2, 3221225472  ;;  %v45_v4 = vld [vmem:[#allocation5 + $0x8] sm:$0xff]  ;;  %v38_v5 = vld [vmem:[#allocation2 + $0x10] sm:$0xff]  ;;  %s67_s0 = int_to_ptr.vmem [resolvable:$true] %s66_s0 }
  0x1b   :  { %v48_v3 = vmul.f32 1.3333334, %v44_v1  ;;  %v49_v6 = vmul.f32 1.3333334, %v45_v4  ;;  %vm42_vm2 = vcmp.lt.u32.totalorder %v38_v5, 3221225472  ;;  %v46_v7 = vld [vmem:[#allocation5 + $0x10] sm:$0xff]  ;;  %p124_p11 = scmp.lt.s32.totalorder %s67_s0, %s67_s0 }
  0x1c   :  { %v39_v8 = vld [vmem:[#allocation2 + $0x18] sm:$0xff]  ;;  %v50_v11 = vmul.f32 1.3333334, %v46_v7  ;;  %s119_s1 = scalar_lea.vmem %s67_s0, 512 }
  0x1d   :  { %v47_v9 = vld [vmem:[#allocation5 + $0x18] sm:$0xff]  ;;  %v52_v10 = vsel %vm40_vm0, %v48_v3, 0.0  ;;  %vm43_vm3 = vcmp.lt.u32.totalorder %v39_v8, 3221225472  ;;  %v53_v13 = vsel %vm41_vm1, %v49_v6, 0.0  ;;  %p120_p10 = scmp.ne.s32.totalorder %s67_s0, %s119_s1  ;;  %p125_p12 = scmp.lt.s32.totalorder %s119_s1, %s119_s1 }
  0x1e   :  { %v51_v12 = vmul.f32 1.3333334, %v47_v9  ;;  %56 = vst [vmem:[#allocation7] sm:$0xff] %v52_v10  ;;  %57 = vst [vmem:[#allocation7 + $0x8] sm:$0xff] %v53_v13  ;;  %v54_v14 = vsel %vm42_vm2, %v50_v11, 0.0 }
  0x1f   :  { %58 = vst [vmem:[#allocation7 + $0x10] sm:$0xff] %v54_v14  ;;  %p126_p13 = por %p125_p12, %p124_p11 }
  0x20   :  { %v55_v15 = vsel %vm43_vm3, %v51_v12, 0.0 }
  0x21   :  { %59 = vst [vmem:[#allocation7 + $0x18] sm:$0xff] %v55_v15  ;;  %p127_p0 = pnand %p126_p13, %p120_p10 }
  0x23   :  { %130 = shalt.err (!%p127_p0)
}
  0x24   :  { %69 = dma.vmem_to_hbm [thread:$0]  %s67_s0, 512, %s174_s2, [#allocation4]  }
  0x25   :  { %143 = dma.done.wait [#allocation4], 512  }
  0x26   :  { %144 = vsyncadd [#allocation4], 4294966784 }
  0x27   :  { %73 = vsyncpa [#allocation3], 1 }
  0x28   :  { %74 = vsyncpa [#allocation6], 1 }
  0x29   :  { %75 = vsyncpa [#allocation4], 1 }

</bundles_post_ra>
